<compile_context>
chip_gen: v6e
topology: v6e:2x2x1
jax: 0.10.0
libtpu: 0.0.40
codegen_flags: <defaults>
</compile_context>

<pallas_src>
import functools
import math

import jax
import jax.numpy as jnp
from jax.experimental import pallas as pl
from jax.experimental.pallas import tpu as pltpu


def _round_up(v: int, m: int) -> int:
    return ((v + m - 1) // m) * m


def _mlp_kernel(x_ref, w1_ref, b1_ref, w2_ref, b2_ref, o_ref):
    # Fused Linear -> ReLU -> Linear on one batch tile, fully in VMEM.
    # f32 input cast to bf16 in-kernel (VPU); MXU accumulates in f32.
    x = x_ref[...].astype(w1_ref.dtype)
    h = jnp.dot(x, w1_ref[...], preferred_element_type=jnp.float32)
    h = jnp.maximum(h + b1_ref[...], 0.0)            # f32 bias + ReLU on the VPU
    h = h.astype(w2_ref.dtype)                       # bf16 for the second MXU pass
    out = jnp.dot(h, w2_ref[...], preferred_element_type=jnp.float32)
    o_ref[...] = (out + b2_ref[...]).astype(o_ref.dtype)


def prepare_params(w1, b1, w2, b2, compute_dtype=jnp.bfloat16):
    """One-time prep: bf16 matmul weights, f32 biases as (1, N) rows.
    No padding: every dim is consumed as a full-array block."""
    w1p = w1.astype(compute_dtype)
    w2p = w2.astype(compute_dtype)
    b1p = b1.astype(jnp.float32).reshape(1, -1)
    b2p = b2.astype(jnp.float32).reshape(1, -1)
    return (w1p, b1p, w2p, b2p)


def _num_tensorcores() -> int:
    """2 TensorCores per chip on v7x, else 1 (v5e / v6e)."""
    try:
        kind = jax.devices()[0].device_kind.lower()
        if "v7" in kind:
            return 2
    except Exception:
        pass
    return 1


def _pick_tile_b(batch: int, max_tile: int = 4096) -> int:
    """Per-generation batch tile: one grid step on single-TC chips, >=2 steps
    per core on v7x. Sublane-aligned (multiple of 8) unless it is the whole
    batch; capped so double-buffered VMEM stays tiny even on v7x (64 MiB)."""
    n_tc = _num_tensorcores()
    if n_tc == 1:
        tile = batch
    else:
        tile = _round_up(pl.cdiv(batch, 2 * n_tc), 8)
    tile = min(tile, max_tile)
    if tile >= batch:
        return batch
    return _round_up(tile, 8)


@functools.partial(jax.jit, static_argnames=("tile_b",))
def _dqn_forward_impl(x, w1, b1, w2, b2, *, tile_b):
    batch, in_size = x.shape
    hid = w1.shape[1]
    out_size = w2.shape[1]

    return pl.pallas_call(
        _mlp_kernel,
        out_shape=jax.ShapeDtypeStruct((batch, out_size), jnp.float32),
        grid_spec=pltpu.PrefetchScalarGridSpec(
            num_scalar_prefetch=0,
            grid=(pl.cdiv(batch, tile_b),),          # ragged edge handled by Pallas
            in_specs=[
                pl.BlockSpec((tile_b, in_size), lambda i: (i, 0)),   # x tile (f32)
                pl.BlockSpec((in_size, hid), lambda i: (0, 0)),      # W1 (resident)
                pl.BlockSpec((1, hid), lambda i: (0, 0)),            # b1
                pl.BlockSpec((hid, out_size), lambda i: (0, 0)),     # W2 (resident)
                pl.BlockSpec((1, out_size), lambda i: (0, 0)),       # b2
            ],
            out_specs=pl.BlockSpec((tile_b, out_size), lambda i: (i, 0)),
        ),
        compiler_params=pltpu.CompilerParams(
            dimension_semantics=("parallel",),        # megacore batch split on v7x
        ),
    )(x, w1, b1, w2, b2)


def dqn_forward(x, params, *, tile_b=None):
    """Fused Linear->ReLU->Linear; f32 in, f32 logits out (module semantics)."""
    if tile_b is None:
        tile_b = _pick_tile_b(x.shape[0])
    w1, b1, w2, b2 = params
    return _dqn_forward_impl(x, w1, b1, w2, b2, tile_b=tile_b)


def init_linear_params(key, in_features, out_features, dtype=jnp.float32):
    """Deterministic init matching nn.Linear's U(-1/sqrt(fan_in), 1/sqrt(fan_in)).
    Weight stored as (in_features, out_features) = PyTorch weight.T."""
    kw, kb = jax.random.split(key)
    bound = 1.0 / math.sqrt(in_features)
    w = jax.random.uniform(
        kw, (in_features, out_features), dtype, minval=-bound, maxval=bound)
    b = jax.random.uniform(kb, (out_features,), dtype, minval=-bound, maxval=bound)
    return w, b


def reference_forward_f32(x, w1, b1, w2, b2):
    h = jnp.maximum(x @ w1 + b1, 0.0)
    return h @ w2 + b2


def reference_forward_bf16(x, w1, b1, w2, b2, compute_dtype=jnp.bfloat16):
    # Same numerics as the kernel: bf16 matmul inputs, f32 accumulation/bias.
    xc = x.astype(compute_dtype)
    h = jnp.dot(xc, w1.astype(compute_dtype),
                preferred_element_type=jnp.float32) + b1
    h = jnp.maximum(h, 0.0).astype(compute_dtype)
    out = jnp.dot(h, w2.astype(compute_dtype),
                  preferred_element_type=jnp.float32) + b2
    return out


if __name__ == "__main__":
    # Small DQN-style shapes; batch deliberately NOT a multiple of the tile.
    batch, input_size, hidden_size, output_size = 50, 16, 32, 4

    key = jax.random.PRNGKey(0)
    kx, k1, k2 = jax.random.split(key, 3)

    x = jax.random.normal(kx, (batch, input_size), jnp.float32)
    w1, b1 = init_linear_params(k1, input_size, hidden_size)
    w2, b2 = init_linear_params(k2, hidden_size, output_size)

    params = prepare_params(w1, b1, w2, b2)

    # Auto-picked grid: 1 step on v5e/v6e, >=2 steps per core on v7x.
    out = jax.block_until_ready(dqn_forward(x, params))
    assert out.shape == (batch, output_size)

    # Explicit multi-step grid with a ragged edge (50 rows, 16-row tiles):
    # exercises pl.cdiv grid + Pallas edge-block padding / masked writes.
    out_tiled = jax.block_until_ready(dqn_forward(x, params, tile_b=16))
    assert out_tiled.shape == (batch, output_size)

    ref_bf16 = reference_forward_bf16(x, w1, b1, w2, b2)   # identical compute path
    ref_f32 = reference_forward_f32(x, w1, b1, w2, b2)     # exact module semantics
    for o in (out, out_tiled):
        assert jnp.allclose(o, ref_bf16, atol=1e-3, rtol=1e-3)
        assert jnp.allclose(o, ref_f32, atol=5e-2, rtol=5e-2)

    print("KERNEL_OK")
</pallas_src>

<mosaic_0001>
module attributes {stable_mosaic.version = 11 : i64} {
  func.func @_mlp_kernel(%arg0: i32, %arg1: memref<50x16xf32, #tpu.memory_space<vmem>>, %arg2: memref<16x32xbf16, #tpu.memory_space<vmem>>, %arg3: memref<1x32xf32, #tpu.memory_space<vmem>>, %arg4: memref<32x4xbf16, #tpu.memory_space<vmem>>, %arg5: memref<1x4xf32, #tpu.memory_space<vmem>>, %arg6: memref<50x4xf32, #tpu.memory_space<vmem>>) attributes {dimension_semantics = [#tpu.dimension_semantics<parallel>], iteration_bounds = array<i64: 1>, scalar_prefetch = 0 : i64, scratch_operands = 0 : i64, tpu.core_type = #tpu.core_type<tc>, window_params = [{transform_indices = @transform_0, window_bounds = array<i64: 50, 16>}, {pipeline_mode = #tpu.pipeline_mode<synchronous>, transform_indices = @transform_1, window_bounds = array<i64: 16, 32>}, {pipeline_mode = #tpu.pipeline_mode<synchronous>, transform_indices = @transform_2, window_bounds = array<i64: 1, 32>}, {pipeline_mode = #tpu.pipeline_mode<synchronous>, transform_indices = @transform_3, window_bounds = array<i64: 32, 4>}, {pipeline_mode = #tpu.pipeline_mode<synchronous>, transform_indices = @transform_4, window_bounds = array<i64: 1, 4>}, {transform_indices = @transform_5, window_bounds = array<i64: 50, 4>}]} {
    %c0 = arith.constant 0 : index
    %c0_0 = arith.constant 0 : index
    %0 = vector.load %arg1[%c0, %c0_0] : memref<50x16xf32, #tpu.memory_space<vmem>>, vector<50x16xf32>
    %1 = arith.truncf %0 : vector<50x16xf32> to vector<50x16xbf16>
    %c0_1 = arith.constant 0 : index
    %c0_2 = arith.constant 0 : index
    %2 = vector.load %arg2[%c0_1, %c0_2] : memref<16x32xbf16, #tpu.memory_space<vmem>>, vector<16x32xbf16>
    %cst = arith.constant dense<0.000000e+00> : vector<50x32xf32>
    %3 = tpu.matmul %1, %2, %cst {dimension_numbers = #tpu.dot_dimension_numbers<[1], [0], [0], [1], [0, 0, 1, 1], [], []>} : vector<50x16xbf16>, vector<16x32xbf16>, vector<50x32xf32> -> vector<50x32xf32>
    %c0_3 = arith.constant 0 : index
    %c0_4 = arith.constant 0 : index
    %4 = vector.load %arg3[%c0_3, %c0_4] : memref<1x32xf32, #tpu.memory_space<vmem>>, vector<1x32xf32>
    %5 = vector.broadcast %4 : vector<1x32xf32> to vector<50x32xf32>
    %6 = arith.addf %3, %5 : vector<50x32xf32>
    %cst_5 = arith.constant 0.000000e+00 : f32
    %7 = vector.broadcast %cst_5 : f32 to vector<50x32xf32>
    %8 = arith.maximumf %6, %7 : vector<50x32xf32>
    %9 = arith.truncf %8 : vector<50x32xf32> to vector<50x32xbf16>
    %c0_6 = arith.constant 0 : index
    %c0_7 = arith.constant 0 : index
    %10 = vector.load %arg4[%c0_6, %c0_7] : memref<32x4xbf16, #tpu.memory_space<vmem>>, vector<32x4xbf16>
    %cst_8 = arith.constant dense<0.000000e+00> : vector<50x4xf32>
    %11 = tpu.matmul %9, %10, %cst_8 {dimension_numbers = #tpu.dot_dimension_numbers<[1], [0], [0], [1], [0, 0, 1, 1], [], []>} : vector<50x32xbf16>, vector<32x4xbf16>, vector<50x4xf32> -> vector<50x4xf32>
    %c0_9 = arith.constant 0 : index
    %c0_10 = arith.constant 0 : index
    %12 = vector.load %arg5[%c0_9, %c0_10] : memref<1x4xf32, #tpu.memory_space<vmem>>, vector<1x4xf32>
    %13 = vector.broadcast %12 : vector<1x4xf32> to vector<50x4xf32>
    %14 = arith.addf %11, %13 : vector<50x4xf32>
    %c0_11 = arith.constant 0 : index
    %c0_12 = arith.constant 0 : index
    %15 = vector.load %arg6[%c0_11, %c0_12] : memref<50x4xf32, #tpu.memory_space<vmem>>, vector<50x4xf32>
    tpu.vector_store %arg6[%c0_11, %c0_12], %14 {strides = array<i32>} : memref<50x4xf32, #tpu.memory_space<vmem>>, vector<50x4xf32>,
    return
  }
  func.func @transform_0(%arg0: i32) -> (i32, i32) {
    %c0_i32 = arith.constant 0 : i32
    %c0_i32_0 = arith.constant 0 : i32
    return %arg0, %c0_i32 : i32, i32
  }
  func.func @transform_1(%arg0: i32) -> (i32, i32) {
    %c0_i32 = arith.constant 0 : i32
    %c0_i32_0 = arith.constant 0 : i32
    %c0_i32_1 = arith.constant 0 : i32
    return %c0_i32, %c0_i32_0 : i32, i32
  }
  func.func @transform_2(%arg0: i32) -> (i32, i32) {
    %c0_i32 = arith.constant 0 : i32
    %c0_i32_0 = arith.constant 0 : i32
    %c0_i32_1 = arith.constant 0 : i32
    return %c0_i32, %c0_i32_0 : i32, i32
  }
  func.func @transform_3(%arg0: i32) -> (i32, i32) {
    %c0_i32 = arith.constant 0 : i32
    %c0_i32_0 = arith.constant 0 : i32
    %c0_i32_1 = arith.constant 0 : i32
    return %c0_i32, %c0_i32_0 : i32, i32
  }
  func.func @transform_4(%arg0: i32) -> (i32, i32) {
    %c0_i32 = arith.constant 0 : i32
    %c0_i32_0 = arith.constant 0 : i32
    %c0_i32_1 = arith.constant 0 : i32
    return %c0_i32, %c0_i32_0 : i32, i32
  }
  func.func @transform_5(%arg0: i32) -> (i32, i32) {
    %c0_i32 = arith.constant 0 : i32
    %c0_i32_0 = arith.constant 0 : i32
    return %arg0, %c0_i32 : i32, i32
  }
}

</mosaic_0001>

<bundles_post_ra>
// kernel: _dqn_forward_impl.1
= control target key start
LH: loop header
LB: loop body
LE: loop exit
PB: predicated region body
PF: predicated region fallthrough
CT: control target
= control target key end

     0   :  { %vm47_vm0 = vcmask 130048   ;;  %vm158_vm1 = vcmask 261120   ;;  %vm235_vm2 = vcmask 31744   ;;  %vm242_vm3 = vcmask 25600   ;;  %s394_s1 = inlined_call_operand.vmem [shape: bf16[16,32], index: 1, kind: input, shape index: {}]   ;;  %s395_s0 = inlined_call_operand.vmem [shape: f32[50,16], index: 0, kind: input, shape index: {}]   ;;  %s396_s3 = inlined_call_operand.vmem [shape: bf16[32,4], index: 3, kind: input, shape index: {}]   ;;  %s397_s2 = inlined_call_operand.vmem [shape: f32[1,32], index: 2, kind: input, shape index: {}]   ;;  %s398_s4 = inlined_call_operand.vmem [shape: f32[1,4], index: 4, kind: input, shape index: {}]   ;;  %s399_s5 = inlined_call_operand.vmem [shape: f32[50,4], index: 5, kind: output, shape index: {}]  }
   0x1   :  { %v294_v0 = vld [vmem:[%s394_s1] sm:$0xff]   ;;  %v22_v2 = vld [vmem:[%s395_s0 + $0x8] sm:$0xff]  ;;  %v23_v3 = vld [vmem:[%s395_s0 + $0x10] sm:$0xff] }
   0x2   :  { %v21_v1 = vld [vmem:[%s395_s0] sm:$0xff]  ;;  %272 = vmatprep.subr.bf16.mxu0 %v294_v0  ;;  %v24_v5 = vld [vmem:[%s395_s0 + $0x18] sm:$0xff]  ;;  %v26_v7 = vld [vmem:[%s395_s0 + $0x28] sm:$0xff] }
   0x3   :  { %v28_v4 = vpack.c.bf16 %v22_v2, %v21_v1  ;;  %v25_v6 = vld [vmem:[%s395_s0 + $0x20] sm:$0xff]  ;;  %273 = vmatpush3.bf16.msra.mxu0 %v294_v0  ;;  %v29_v8 = vpack.c.bf16 %v24_v5, %v23_v3  ;;  %v27_v10 = vld [vmem:[%s395_s0 + $0x30] sm:$0x3]  ;;  %v295_v12 = vld [vmem:[%s396_s3 + $0x8] sm:$0xff]  }
   0x4   :  { %v30_v9 = vpack.c.bf16 %v26_v7, %v25_v6  ;;  %v31_v11 = vpack.c.bf16 %v27_v10, %v27_v10  ;;  %282 = vmatprep.subr.bf16.mxu1 %v295_v12  ;;  %v296_v13 = vld [vmem:[%s396_s3] sm:$0xff]  }
   0x5   :  { %274 = vmatprep.mubr.msk.bf16.mxu0 %vm47_vm0, %v28_v4  ;;  %283 = vmatpush3.bf16.msra.mxu1 %v295_v12  ;;  %v248_v16 = vld [vmem:[%s397_s2] ss:$0 sm:$0xff] }
   0x6   :  { %275 = vmatmul.mubr.msk.bf16.vlgmr.msra.gmra.mxu0 %vm47_vm0, %v29_v8  ;;  %284 = vmatprep.subr.bf16.mxu1 %v296_v13  ;;  %v254_v41 = vld [vmem:[%s398_s4] ss:$0 sm:$0xff] }
   0x7   :  { %278 = vmatprep.mubr.msk.bf16.mxu0 %vm47_vm0, %v30_v9 }
   0x9   :  { %285 = vmatpush3.bf16.msra.mxu1 %v296_v13 }
   0xe   :  { %279 = vmatmul.mubr.msk.bf16.gmra.mxu0 %vm47_vm0, %v31_v11 }
  0xc6   :  { %v276_v14 = vpop.f32.mrf.mxu0 }
  0xc7   :  { %v103_v20 = vadd.f32 %v276_v14, %v248_v16 }
  0xc8   :  { %v94_v15 = vpop.f32.mrf.mxu0 }
  0xc9   :  { %v95_v18 = vadd.f32 %v248_v16, %v94_v15  ;;  %v126_v27 = vmax.f32 %v103_v20, 0.0 }
  0xca   :  { %v277_v17 = vpop.f32.mrf.mxu0 }
  0xcb   :  { %v106_v19 = vadd.f32 %v277_v17, %v248_v16  ;;  %v124_v25 = vmax.f32 %v95_v18, 0.0 }
  0xcc   :  { %v97_v21 = vpop.f32.mrf.mxu0 }
  0xcd   :  { %v98_v22 = vadd.f32 %v248_v16, %v97_v21  ;;  %v127_v23 = vmax.f32 %v106_v19, 0.0 }
  0xce   :  { %v280_v24 = vpop.f32.mrf.mxu0 }
  0xcf   :  { %v125_v26 = vmax.f32 %v98_v22, 0.0  ;;  %v132_v30 = vpack.c.bf16 %v127_v23, %v126_v27  ;;  %v119_v31 = vadd.f32 %v280_v24, %v248_v16 }
  0xd0   :  { %v110_v28 = vpop.f32.mrf.mxu0 }
  0xd1   :  { %v131_v29 = vpack.c.bf16 %v125_v26, %v124_v25  ;;  %v111_v33 = vadd.f32 %v248_v16, %v110_v28  ;;  %v130_v36 = vmax.f32 %v119_v31, 0.0 }
  0xd2   :  { %v281_v32 = vpop.f32.mrf.mxu0 }
  0xd3   :  { %286 = vmatprep.mubr.msk.bf16.mxu1 %vm158_vm1, %v131_v29  ;;  %v128_v37 = vmax.f32 %v111_v33, 0.0  ;;  %v134_v40 = vpack.c.bf16 %v130_v36, %v130_v36 }
  0xd4   :  { %v113_v34 = vpop.f32.mrf.mxu0  ;;  %287 = vmatmul.mubr.msk.bf16.vlgmr.msra.gmra.mxu1 %vm158_vm1, %v132_v30 }
  0xd5   :  { %v114_v35 = vadd.f32 %v248_v16, %v113_v34 }
  0xd7   :  { %v129_v38 = vmax.f32 %v114_v35, 0.0 }
  0xd9   :  { %v133_v39 = vpack.c.bf16 %v129_v38, %v128_v37 }
  0xdb   :  { %290 = vmatprep.mubr.msk.bf16.mxu1 %vm158_vm1, %v133_v39 }
  0xdc   :  { %291 = vmatmul.mubr.msk.bf16.gmra.mxu1 %vm158_vm1, %v134_v40 }
 0x194   :  { %v288_v42 = vpop.f32.mrf.mxu1 }
 0x195   :  { %v214_v43 = vadd.f32 %v288_v42, %v254_v41 }
 0x196   :  { %v205_v44 = vpop.f32.mrf.mxu1 }
 0x197   :  { %238 = vst.msk [vmem:[%s399_s5 + $0x10] sm:$0xff] %vm235_vm2, %v214_v43  ;;  %v206_v45 = vadd.f32 %v254_v41, %v205_v44 }
 0x198   :  { %v289_v46 = vpop.f32.mrf.mxu1 }
 0x199   :  { %236 = vst.msk [vmem:[%s399_s5] sm:$0xff] %vm235_vm2, %v206_v45  ;;  %v217_v47 = vadd.f32 %v289_v46, %v254_v41 }
 0x19a   :  { %v208_v48 = vpop.f32.mrf.mxu1 }
 0x19b   :  { %239 = vst.msk [vmem:[%s399_s5 + $0x18] sm:$0xff] %vm235_vm2, %v217_v47  ;;  %v209_v49 = vadd.f32 %v254_v41, %v208_v48 }
 0x19c   :  { %v292_v50 = vpop.f32.mrf.mxu1 }
 0x19d   :  { %237 = vst.msk [vmem:[%s399_s5 + $0x8] sm:$0xff] %vm235_vm2, %v209_v49  ;;  %v230_v51 = vadd.f32 %v292_v50, %v254_v41 }
 0x19e   :  { %v221_v52 = vpop.f32.mrf.mxu1 }
 0x19f   :  { %243 = vst.msk [vmem:[%s399_s5 + $0x30] sm:$0x3] %vm242_vm3, %v230_v51  ;;  %v222_v53 = vadd.f32 %v254_v41, %v221_v52 }
 0x1a0   :  { %v293_v54 = vpop.f32.mrf.mxu1 }
 0x1a1   :  { %240 = vst.msk [vmem:[%s399_s5 + $0x20] sm:$0xff] %vm235_vm2, %v222_v53 }
 0x1a2   :  { %v224_v55 = vpop.f32.mrf.mxu1 }
 0x1a3   :  { %v225_v56 = vadd.f32 %v254_v41, %v224_v55 }
 0x1a5   :  { %241 = vst.msk [vmem:[%s399_s5 + $0x28] sm:$0xff] %vm235_vm2, %v225_v56 }

</bundles_post_ra>
